<compile_context>
chip_gen: v7x
topology: tpu7x:2x2x1
jax: 0.10.0
libtpu: 0.0.40
codegen_flags: <defaults>
</compile_context>

<pallas_src>
import functools

import jax
import jax.numpy as jnp
from jax.experimental import pallas as pl
from jax.experimental.pallas import tpu as pltpu

# VAEConfig used for the demo: input_dim=16, hidden_dim=32, latent_dim=8,
# depth=2, act_fn=ReLU.
INPUT_DIM = 16
HIDDEN_DIM = 32
LATENT_DIM = 8
DEPTH = 2

LANE = 128  # TPU lane width; final layer is padded to this for dense stores.


def _round_up(x, m):
    return ((x + m - 1) // m) * m


def _sigmoid(x):
    # Numerically stable logistic (no overflow in either branch).
    # exp() runs on the EUP slot, so it overlaps with the VPU select/add.
    e = jnp.exp(-jnp.abs(x))
    return jnp.where(x >= 0.0, 1.0 / (1.0 + e), e / (1.0 + e))


def _decoder_kernel(z_ref, *refs):
    """refs = (w1, b1, w2, b2, ..., wN, bN, out_ref)."""
    out_ref = refs[-1]
    param_refs = refs[:-1]
    n_layers = len(param_refs) // 2

    h = z_ref[...]                                            # (TB, latent)
    for li in range(n_layers):
        w = param_refs[2 * li][...]
        b = param_refs[2 * li + 1][...]
        h = jnp.dot(h, w, preferred_element_type=jnp.float32) + b
        if li < n_layers - 1:                                 # hidden layers: ReLU
            h = jnp.maximum(h, 0.0)
    out_ref[...] = _sigmoid(h)                                # (TB, 128) lane-dense


def decoder_layer_dims(latent_dim, hidden_dim, output_dim, depth):
    """Layer widths of DecoderMLP (mirrors the PyTorch constructor)."""
    assert hidden_dim // 2 ** (depth - 1) >= 1
    if depth == 1:
        dims = [latent_dim, hidden_dim, output_dim]
    else:
        dims = [latent_dim, hidden_dim // 2 ** (depth - 1)]
        for i in range(depth - 2, -1, -1):
            dims.append(hidden_dim // 2 ** i)
        dims.append(output_dim)
    return dims


def init_params(key, latent_dim, hidden_dim, input_dim, depth):
    """PyTorch-nn.Linear-style init. Weights stored (in, out), biases (1, out)."""
    dims = decoder_layer_dims(latent_dim, hidden_dim, input_dim, depth)

    def linear(k, fan_in, fan_out):
        kw, kb = jax.random.split(k)
        bound = 1.0 / jnp.sqrt(fan_in)
        w = jax.random.uniform(kw, (fan_in, fan_out), jnp.float32, -bound, bound)
        b = jax.random.uniform(kb, (1, fan_out), jnp.float32, -bound, bound)
        return w, b

    keys = jax.random.split(key, len(dims) - 1)
    return [linear(keys[i], dims[i], dims[i + 1]) for i in range(len(dims) - 1)]


@functools.partial(jax.jit, static_argnames=("block_b",))
def bernoulli_decoder_forward(z, params, *, block_b=256):
    """sigmoid(DecoderMLP(z)) as one batch-tiled Pallas kernel."""
    assert block_b % 8 == 0
    B, L = z.shape
    out_dim = params[-1][0].shape[1]

    # Batch tile: multiple of 8 sublanes, capped by the (padded) batch.
    TB = min(block_b, _round_up(B, 8))
    Bp = _round_up(B, TB)
    if Bp != B:
        z = jnp.pad(z, ((0, Bp - B), (0, 0)))

    # Lane-pad the final layer so the kernel's output store is unmasked.
    lane_out = _round_up(max(out_dim, LANE), LANE)
    flat = []
    for li, (w, b) in enumerate(params):
        if li == len(params) - 1:
            w = jnp.pad(w, ((0, 0), (0, lane_out - out_dim)))
            b = jnp.pad(b, ((0, 0), (0, lane_out - out_dim)))
        flat += [w, b]

    grid = (Bp // TB,)
    in_specs = [pl.BlockSpec((TB, L), lambda i: (i, 0))]
    # Weights/biases: full-array blocks, constant index map -> VMEM-resident
    # across grid steps (no re-DMA when the block index repeats).
    for p in flat:
        in_specs.append(pl.BlockSpec(p.shape, lambda i: (0, 0)))
    out_specs = pl.BlockSpec((TB, lane_out), lambda i: (i, 0))

    out = pl.pallas_call(
        _decoder_kernel,
        grid=grid,
        in_specs=in_specs,
        out_specs=out_specs,
        out_shape=jax.ShapeDtypeStruct((Bp, lane_out), jnp.float32),
        compiler_params=pltpu.CompilerParams(
            dimension_semantics=("parallel",)),
    )(z, *flat)

    # Strip batch padding and lane padding in the wrapper (outside the kernel).
    return out[:B, :out_dim]


def bernoulli_decoder_reference(z, params):
    """Pure-JAX reference."""
    h = z
    n = len(params)
    for li, (w, b) in enumerate(params):
        h = h @ w + b
        if li < n - 1:
            h = jnp.maximum(h, 0.0)
    return jax.nn.sigmoid(h)


if __name__ == "__main__":
    key = jax.random.PRNGKey(0)
    k_params, k_z = jax.random.split(key)

    params = init_params(k_params, LATENT_DIM, HIDDEN_DIM, INPUT_DIM, DEPTH)

    # Small demo batch; 50 is deliberately not a multiple of the tile so the
    # batch-padding path is exercised (block_b=16 -> grid of 4 steps).
    B = 50
    z = jax.random.normal(k_z, (B, LATENT_DIM), jnp.float32)
    ref = bernoulli_decoder_reference(z, params)

    # Multi-step grid (exercises batch padding + VMEM-resident weights).
    out = bernoulli_decoder_forward(z, params, block_b=16)
    out = jax.block_until_ready(out)
    assert out.shape == ref.shape, (out.shape, ref.shape)
    assert jnp.allclose(out, ref, rtol=1e-5, atol=1e-5), (
        float(jnp.max(jnp.abs(out - ref))))

    # Default tile (single grid step, TB capped to the padded batch).
    out2 = jax.block_until_ready(bernoulli_decoder_forward(z, params))
    assert jnp.allclose(out2, ref, rtol=1e-5, atol=1e-5), (
        float(jnp.max(jnp.abs(out2 - ref))))

    print("KERNEL_OK")
</pallas_src>

<mosaic_0001>
module attributes {stable_mosaic.version = 11 : i64} {
  func.func @_decoder_kernel(%arg0: i32, %arg1: memref<16x8xf32, #tpu.memory_space<vmem>>, %arg2: memref<8x16xf32, #tpu.memory_space<vmem>>, %arg3: memref<1x16xf32, #tpu.memory_space<vmem>>, %arg4: memref<16x32xf32, #tpu.memory_space<vmem>>, %arg5: memref<1x32xf32, #tpu.memory_space<vmem>>, %arg6: memref<32x128xf32, #tpu.memory_space<vmem>>, %arg7: memref<1x128xf32, #tpu.memory_space<vmem>>, %arg8: memref<16x128xf32, #tpu.memory_space<vmem>>) attributes {dimension_semantics = [#tpu.dimension_semantics<parallel>], iteration_bounds = array<i64: 4>, scalar_prefetch = 0 : i64, scratch_operands = 0 : i64, tpu.core_type = #tpu.core_type<tc>, window_params = [{transform_indices = @transform_0, window_bounds = array<i64: 16, 8>}, {pipeline_mode = #tpu.pipeline_mode<synchronous>, transform_indices = @transform_1, window_bounds = array<i64: 8, 16>}, {pipeline_mode = #tpu.pipeline_mode<synchronous>, transform_indices = @transform_2, window_bounds = array<i64: 1, 16>}, {pipeline_mode = #tpu.pipeline_mode<synchronous>, transform_indices = @transform_3, window_bounds = array<i64: 16, 32>}, {pipeline_mode = #tpu.pipeline_mode<synchronous>, transform_indices = @transform_4, window_bounds = array<i64: 1, 32>}, {pipeline_mode = #tpu.pipeline_mode<synchronous>, transform_indices = @transform_5, window_bounds = array<i64: 32, 128>}, {pipeline_mode = #tpu.pipeline_mode<synchronous>, transform_indices = @transform_6, window_bounds = array<i64: 1, 128>}, {transform_indices = @transform_7, window_bounds = array<i64: 16, 128>}]} {
    %c0 = arith.constant 0 : index
    %c0_0 = arith.constant 0 : index
    %0 = vector.load %arg1[%c0, %c0_0] : memref<16x8xf32, #tpu.memory_space<vmem>>, vector<16x8xf32>
    %c0_1 = arith.constant 0 : index
    %c0_2 = arith.constant 0 : index
    %1 = vector.load %arg2[%c0_1, %c0_2] : memref<8x16xf32, #tpu.memory_space<vmem>>, vector<8x16xf32>
    %c0_3 = arith.constant 0 : index
    %c0_4 = arith.constant 0 : index
    %2 = vector.load %arg3[%c0_3, %c0_4] : memref<1x16xf32, #tpu.memory_space<vmem>>, vector<1x16xf32>
    %cst = arith.constant dense<0.000000e+00> : vector<16x16xf32>
    %3 = tpu.matmul %0, %1, %cst {dimension_numbers = #tpu.dot_dimension_numbers<[1], [0], [0], [1], [0, 0, 1, 1], [], []>} : vector<16x8xf32>, vector<8x16xf32>, vector<16x16xf32> -> vector<16x16xf32>
    %4 = vector.broadcast %2 : vector<1x16xf32> to vector<16x16xf32>
    %5 = arith.addf %3, %4 : vector<16x16xf32>
    %cst_5 = arith.constant 0.000000e+00 : f32
    %6 = vector.broadcast %cst_5 : f32 to vector<16x16xf32>
    %7 = arith.maximumf %5, %6 : vector<16x16xf32>
    %c0_6 = arith.constant 0 : index
    %c0_7 = arith.constant 0 : index
    %8 = vector.load %arg4[%c0_6, %c0_7] : memref<16x32xf32, #tpu.memory_space<vmem>>, vector<16x32xf32>
    %c0_8 = arith.constant 0 : index
    %c0_9 = arith.constant 0 : index
    %9 = vector.load %arg5[%c0_8, %c0_9] : memref<1x32xf32, #tpu.memory_space<vmem>>, vector<1x32xf32>
    %cst_10 = arith.constant dense<0.000000e+00> : vector<16x32xf32>
    %10 = tpu.matmul %7, %8, %cst_10 {dimension_numbers = #tpu.dot_dimension_numbers<[1], [0], [0], [1], [0, 0, 1, 1], [], []>} : vector<16x16xf32>, vector<16x32xf32>, vector<16x32xf32> -> vector<16x32xf32>
    %11 = vector.broadcast %9 : vector<1x32xf32> to vector<16x32xf32>
    %12 = arith.addf %10, %11 : vector<16x32xf32>
    %cst_11 = arith.constant 0.000000e+00 : f32
    %13 = vector.broadcast %cst_11 : f32 to vector<16x32xf32>
    %14 = arith.maximumf %12, %13 : vector<16x32xf32>
    %c0_12 = arith.constant 0 : index
    %c0_13 = arith.constant 0 : index
    %15 = vector.load %arg6[%c0_12, %c0_13] : memref<32x128xf32, #tpu.memory_space<vmem>>, vector<32x128xf32>
    %c0_14 = arith.constant 0 : index
    %c0_15 = arith.constant 0 : index
    %16 = vector.load %arg7[%c0_14, %c0_15] : memref<1x128xf32, #tpu.memory_space<vmem>>, vector<1x128xf32>
    %cst_16 = arith.constant dense<0.000000e+00> : vector<16x128xf32>
    %17 = tpu.matmul %14, %15, %cst_16 {dimension_numbers = #tpu.dot_dimension_numbers<[1], [0], [0], [1], [0, 0, 1, 1], [], []>} : vector<16x32xf32>, vector<32x128xf32>, vector<16x128xf32> -> vector<16x128xf32>
    %18 = vector.broadcast %16 : vector<1x128xf32> to vector<16x128xf32>
    %19 = arith.addf %17, %18 : vector<16x128xf32>
    %20 = math.absf %19 : vector<16x128xf32>
    %cst_17 = arith.constant 0.000000e+00 : f32
    %21 = vector.broadcast %cst_17 : f32 to vector<16x128xf32>
    %22 = arith.subf %21, %20 : vector<16x128xf32>
    %23 = math.exp %22 : vector<16x128xf32>
    %cst_18 = arith.constant 0.000000e+00 : f32
    %24 = vector.broadcast %cst_18 : f32 to vector<16x128xf32>
    %25 = arith.cmpf oge, %19, %24 : vector<16x128xf32>
    %cst_19 = arith.constant 1.000000e+00 : f32
    %26 = vector.broadcast %cst_19 : f32 to vector<16x128xf32>
    %27 = arith.addf %26, %23 : vector<16x128xf32>
    %cst_20 = arith.constant 1.000000e+00 : f32
    %28 = vector.broadcast %cst_20 : f32 to vector<16x128xf32>
    %29 = arith.divf %28, %27 : vector<16x128xf32>
    %cst_21 = arith.constant 1.000000e+00 : f32
    %30 = vector.broadcast %cst_21 : f32 to vector<16x128xf32>
    %31 = arith.addf %30, %23 : vector<16x128xf32>
    %32 = arith.divf %23, %31 : vector<16x128xf32>
    %33 = arith.select %25, %29, %32 : vector<16x128xi1>, vector<16x128xf32>
    %c0_22 = arith.constant 0 : index
    %c0_23 = arith.constant 0 : index
    %34 = vector.load %arg8[%c0_22, %c0_23] : memref<16x128xf32, #tpu.memory_space<vmem>>, vector<16x128xf32>
    tpu.vector_store %arg8[%c0_22, %c0_23], %33 {strides = array<i32>} : memref<16x128xf32, #tpu.memory_space<vmem>>, vector<16x128xf32>,
    return
  }
  func.func @transform_0(%arg0: i32) -> (i32, i32) {
    %c0_i32 = arith.constant 0 : i32
    %c0_i32_0 = arith.constant 0 : i32
    return %arg0, %c0_i32 : i32, i32
  }
  func.func @transform_1(%arg0: i32) -> (i32, i32) {
    %c0_i32 = arith.constant 0 : i32
    %c0_i32_0 = arith.constant 0 : i32
    %c0_i32_1 = arith.constant 0 : i32
    return %c0_i32, %c0_i32_0 : i32, i32
  }
  func.func @transform_2(%arg0: i32) -> (i32, i32) {
    %c0_i32 = arith.constant 0 : i32
    %c0_i32_0 = arith.constant 0 : i32
    %c0_i32_1 = arith.constant 0 : i32
    return %c0_i32, %c0_i32_0 : i32, i32
  }
  func.func @transform_3(%arg0: i32) -> (i32, i32) {
    %c0_i32 = arith.constant 0 : i32
    %c0_i32_0 = arith.constant 0 : i32
    %c0_i32_1 = arith.constant 0 : i32
    return %c0_i32, %c0_i32_0 : i32, i32
  }
  func.func @transform_4(%arg0: i32) -> (i32, i32) {
    %c0_i32 = arith.constant 0 : i32
    %c0_i32_0 = arith.constant 0 : i32
    %c0_i32_1 = arith.constant 0 : i32
    return %c0_i32, %c0_i32_0 : i32, i32
  }
  func.func @transform_5(%arg0: i32) -> (i32, i32) {
    %c0_i32 = arith.constant 0 : i32
    %c0_i32_0 = arith.constant 0 : i32
    %c0_i32_1 = arith.constant 0 : i32
    return %c0_i32, %c0_i32_0 : i32, i32
  }
  func.func @transform_6(%arg0: i32) -> (i32, i32) {
    %c0_i32 = arith.constant 0 : i32
    %c0_i32_0 = arith.constant 0 : i32
    %c0_i32_1 = arith.constant 0 : i32
    return %c0_i32, %c0_i32_0 : i32, i32
  }
  func.func @transform_7(%arg0: i32) -> (i32, i32) {
    %c0_i32 = arith.constant 0 : i32
    %c0_i32_0 = arith.constant 0 : i32
    return %arg0, %c0_i32 : i32, i32
  }
}

</mosaic_0001>

<bundles_post_ra>
// kernel: bernoulli_decoder_forward.1
= control target key start
LH: loop header
LB: loop body
LE: loop exit
PB: predicated region body
PF: predicated region fallthrough
CT: control target
= control target key end

     0   :  { %s772_s24 = smov 0   ;;  %s826_s0 = inlined_call_operand.vmem [shape: f32[64,8], index: 0, kind: input, shape index: {}]   ;;  %s827_s1 = inlined_call_operand.vmem [shape: f32[8,16], index: 1, kind: input, shape index: {}]   ;;  %s828_s2 = inlined_call_operand.vmem [shape: f32[1,16], index: 2, kind: input, shape index: {}]   ;;  %s829_s3 = inlined_call_operand.vmem [shape: f32[16,32], index: 3, kind: input, shape index: {}]   ;;  %s830_s4 = inlined_call_operand.vmem [shape: f32[1,32], index: 4, kind: input, shape index: {}]   ;;  %s831_s5 = inlined_call_operand.vmem [shape: f32[32,128], index: 5, kind: input, shape index: {}]   ;;  %s832_s6 = inlined_call_operand.vmem [shape: f32[1,128], index: 6, kind: input, shape index: {}]   ;;  %s833_s7 = inlined_call_operand.vmem [shape: f32[64,128], index: 7, kind: output, shape index: {}]  }
   0x1 LB: > { %s640_s25 = sadd.s32 4294967295, %s730_s24   ;;  %p644_p0 = scmp.ge.s32.totalorder %s730_s24, 1  ;;  %s730_s24 = sphi %s772_s24, %s17_s24  }
   0x2   : > { %p238_p1 = scmp.lt.s32.totalorder %s730_s24, 5 }
   0x4   : > { %p239_p2 = pnand %p644_p0, %p238_p1 }
   0x5   : > { %v284_v0 = vld [vmem:[%s827_s1] sm:$0xff] (!%p239_p2)  ;;  %s645_s28 = sshll.u32 (!%p239_p2), %s640_s25, 1  ;;  %vm292_vm0 = vcmask (!%p239_p2), 64512   ;;  %v377_v4 = vld [vmem:[%s829_s3 + $0x8] sm:$0xff] (!%p239_p2)  ;;  %vm385_vm1 = vcmask (!%p239_p2), 130048   ;;  %v471_v16 = vld [vmem:[%s831_s5 + $0x10] sm:$0xff] (!%p239_p2) }
   0x6   : > { %242 = sbr.rel (%p239_p2) target bundleno = 703 (0x2bf), region = 48  ;;  %673 = vmatprep.subr.mxu1 (!%p239_p2), %v284_v0  ;;  %p271_p3 = scmp.lt.s32.totalorder (!%p239_p2), %s645_s28, 7  ;;  %v376_v3 = vld [vmem:[%s829_s3] sm:$0xff] (!%p239_p2)  ;;  %v470_v7 = vld [vmem:[%s831_s5 + $0x8] sm:$0xff] (!%p239_p2)  ;;  %v472_v17 = vld [vmem:[%s831_s5 + $0x18] sm:$0xff] (!%p239_p2)  ;;  %vm480_vm2 = vcmask (!%p239_p2), 261120  }
   0x7   : > { %674 = vmatpush3.msra.mxu1 (!%p239_p2), %v284_v0  ;;  %v696_v5 = vpack.c.bf16 (!%p239_p2), %v377_v4, %v376_v3  ;;  %v469_v6 = vld [vmem:[%s831_s5] sm:$0xff] (!%p239_p2)  ;;  %v704_v18 = vpack.c.bf16 (!%p239_p2), %v472_v17, %v471_v16 }
   0x8   : > { %v700_v8 = vpack.c.bf16 (!%p239_p2), %v470_v7, %v469_v6  ;;  %v649_v9 = vld [vmem:[%s828_s2] ss:$0 sm:$0xff] (!%p239_p2) }
   0x9   : > { %697 = vmatprep.subr.bf16.mxu1 (!%p239_p2), %v696_v5  ;;  %v652_v19 = vld [vmem:[%s830_s4] ss:$0 sm:$0xff] (!%p239_p2) }
   0xa   : > { %701 = vmatprep.subr.bf16.mxu0 (!%p239_p2), %v700_v8  ;;  %v655_v26 = vld [vmem:[%s832_s6] ss:$0 sm:$0xff] (!%p239_p2) }
   0xb   : > { %703 = vmatpush3.bf16.msra.mxu0 (!%p239_p2), %v700_v8 }
   0xc   : > { %705 = vmatprep.subr.bf16.mxu0 (!%p239_p2), %v704_v18 }
   0xd   : > { %s835_s28 = smov (!%p271_p3, %s645_s28), 7 }
   0xe   : > { %s646_s29 = sshll.u32 %s835_s28, 3 }
   0xf   : > { %s274_s9 = scalar_lea.vmem %s826_s0, %s646_s29  ;;  %707 = vmatpush3.bf16.msra.mxu0 %v704_v18  ;;  %s280_s10 = scalar_lea.vmem %s833_s7, %s646_s29 }
  0x10   : > { %v282_v1 = vld [vmem:[%s274_s9] sm:$0xff]  ;;  %v283_v2 = vld [vmem:[%s274_s9 + $0x8] sm:$0xff] }
  0x11   : > { %675 = vmatprep.mubr.msk.f32.mxu1 %vm292_vm0, %v282_v1 }
  0x12   : > { %676 = vmatmul.mubr.msk.f32.vlgmr.msra.gmra.mrb[0].mxu1 %vm292_vm0, %v283_v2 }
  0x13   : > { %699 = vmatpush3.bf16.msra.mxu1 %v696_v5 }
  0xe5   : > { %v677_v10 = vpop.f32.mrb[0].mxu1 }
  0xe6   : > { %v371_v11 = vadd.f32 %v677_v10, %v649_v9  ;;  %v365_v12 = vpop.f32.mrb[1].mxu1 }
  0xe7   : > { %v366_v13 = vadd.f32 %v649_v9, %v365_v12 }
  0xe8   : > { %v375_v15 = vmax.f32 %v371_v11, 0.0 }
  0xe9   : > { %v374_v14 = vmax.f32 %v366_v13, 0.0 }
  0xeb   : > { %682 = vmatprep.mubr.msk.f32.mxu1 %vm385_vm1, %v374_v14 }
  0xec   : > { %683 = vmatmul.mubr.msk.f32.vlgmr.msra.gmra.mrb[2].mxu1 %vm385_vm1, %v375_v15 }
 0x1bf   : > { %v684_v20 = vpop.f32.mrb[2].mxu1 }
 0x1c0   : > { %v464_v21 = vadd.f32 %v684_v20, %v652_v19  ;;  %v458_v22 = vpop.f32.mrb[3].mxu1 }
 0x1c1   : > { %v459_v23 = vadd.f32 %v652_v19, %v458_v22 }
 0x1c2   : > { %v468_v25 = vmax.f32 %v464_v21, 0.0 }
 0x1c3   : > { %v467_v24 = vmax.f32 %v459_v23, 0.0 }
 0x1c5   : > { %693 = vmatprep.mubr.msk.f32.mxu0 %vm480_vm2, %v467_v24 }
 0x1c6   : > { %694 = vmatmul.mubr.msk.f32.vlgmr.msra.gmra.mrb[0].mxu0 %vm480_vm2, %v468_v25 }
 0x299   : > { %v695_v27 = vpop.f32.mrb[0].mxu0 }
 0x29a   : > { %v559_v28 = vadd.f32 %v695_v27, %v655_v26  ;;  %v553_v29 = vpop.f32.mrb[1].mxu0 }
 0x29b   : > { %v554_v30 = vadd.f32 %v655_v26, %v553_v29 }
 0x29c   : > { %v563_v31 = vand.u32 2147483647, %v559_v28  ;;  %vm571_vm4 = vcmp.ge.f32.partialorder %v559_v28, 0.0 }
 0x29d   : > { %v562_v32 = vand.u32 2147483647, %v554_v30  ;;  %vm570_vm3 = vcmp.ge.f32.partialorder %v554_v30, 0.0 }
 0x29e   : > { %v565_v33 = vsub.f32 0.0, %v563_v31 }
 0x29f   : > { %v564_v34 = vsub.f32 0.0, %v562_v32 }
 0x2a0   : > { %v568_v35 = vmul.f32 1.442695, %v565_v33 }
 0x2a1   : > { %v566_v36 = vmul.f32 1.442695, %v564_v34 }
 0x2a2   : > { %716 = vpow2.f32 %v568_v35 }
 0x2a3   : > { %718 = vpow2.f32 %v566_v36 }
 0x2ac   : > { %v717_v37 = vpop.eup %716 }
 0x2ad   : > { %v719_v38 = vpop.eup %718  ;;  %v573_v39 = vadd.f32 1.0, %v717_v37 }
 0x2ae   : > { %v572_v40 = vadd.f32 1.0, %v719_v38 }
 0x2af   : > { %720 = vrcp.f32 %v573_v39 }
 0x2b0   : > { %722 = vrcp.f32 %v572_v40 }
 0x2b9   : > { %v721_v41 = vpop.eup %720 }
 0x2ba   : > { %v723_v42 = vpop.eup %722  ;;  %v579_v43 = vmul.f32 %v721_v41, %v717_v37 }
 0x2bb   : > { %v578_v44 = vmul.f32 %v723_v42, %v719_v38 }
 0x2bc   : > { %v581_v46 = vsel %vm571_vm4, %v721_v41, %v579_v43 }
 0x2bd   : > { %v580_v45 = vsel %vm570_vm3, %v723_v42, %v578_v44  ;;  %583 = vst [vmem:[%s280_s10 + $0x8] sm:$0xff] %v581_v46 }
 0x2be   : > { %582 = vst [vmem:[%s280_s10] sm:$0xff] %v580_v45 }
 0x2bf PF: > { %s17_s24 = sadd.s32 1, %s730_s24  }
 0x2c0   : > { %p14_p4 = scmp.ge.s32.totalorder %s17_s24, 6  }
 0x2c2   :  { %16 = sbr.rel (!%p14_p4) target bundleno = 1 (0x1), region = 78 }

</bundles_post_ra>
